<compile_context>
chip_gen: v5e
topology: v5e:2x2
jax: 0.10.0
libtpu: 0.0.40
codegen_flags: <defaults>
</compile_context>

<pallas_src>
import math

import jax
import jax.numpy as jnp
from jax.experimental import pallas as pl
from jax.experimental.pallas import tpu as pltpu


def build_pe_table(d_model: int, max_len: int = 5000) -> jnp.ndarray:
    """Sinusoidal positional-encoding buffer, shape (max_len, d_model), float32."""
    position = jnp.arange(max_len, dtype=jnp.float32)[:, None]          # (max_len, 1)
    div_term = jnp.exp(
        jnp.arange(0, d_model, 2, dtype=jnp.float32)
        * (-math.log(10000.0) / d_model)
    )                                                                    # (ceil(D/2),)
    angles = position * div_term                                         # (max_len, ceil(D/2))
    pe = jnp.zeros((max_len, d_model), dtype=jnp.float32)
    pe = pe.at[:, 0::2].set(jnp.sin(angles)[:, : (d_model + 1) // 2])
    pe = pe.at[:, 1::2].set(jnp.cos(angles)[:, : d_model // 2])
    return pe


def _pe_add_kernel(x_ref, pe_ref, o_ref):
    # Long-seq path:  x_ref/o_ref (tr, L),    pe_ref (tr, L)
    # Batched path:   x_ref/o_ref (kb, R, L), pe_ref (R, L)  (broadcast over kb)
    x = x_ref[...].astype(jnp.float32)
    o_ref[...] = (x + pe_ref[...]).astype(o_ref.dtype)


def _default_block_byte_target() -> int:
    """Per x-block byte target.

    ~4 MiB amortizes the ~0.35 us per-grid-step overhead against v6e/v7x HBM
    bandwidth; capped at 2 MiB on v5e so the double-buffered footprint stays
    comfortable on that generation."""
    kind = ""
    try:
        kind = jax.devices()[0].device_kind.lower()
    except Exception:
        pass
    if ("v5 lite" in kind) or ("v5e" in kind) or ("v5lite" in kind):
        return 2 << 20
    return 4 << 20


def positional_encoding_forward(
    x: jnp.ndarray,
    pe_table: jnp.ndarray,
    *,
    block_byte_target: int | None = None,
    donate_x: bool = False,
) -> jnp.ndarray:
    """x: (B, S, D); pe_table: (max_len, D) float32. Returns x + pe[:S] over B."""
    B, S, D = x.shape
    assert pe_table.ndim == 2 and pe_table.shape[0] >= S and pe_table.shape[1] == D
    if pe_table.dtype != jnp.float32:
        pe_table = pe_table.astype(jnp.float32)

    isz = x.dtype.itemsize
    target = int(block_byte_target) if block_byte_target else _default_block_byte_target()

    # ---- layout: lane-dense refold when d_model is not a multiple of 128 ------
    if D % 128 == 0:
        R, L = S, D
    elif (S * D) % 128 == 0:
        R, L = (S * D) // 128, 128          # per-batch payload as (R, 128) rows
    else:
        # TODO(synk): neither D nor S*D is a multiple of 128 -> stores lower to
        # masked vst.msk; a padded-D wrapper (or letting XLA fuse the add) would
        # be faster for such shapes. Correctness is unaffected.
        R, L = S, D

    x_v = x.reshape(B, R, L)                 # row-major regroup; no data movement
    row_bytes = L * isz
    slab_bytes = R * row_bytes               # one batch element's payload

    # Double-buffered VMEM footprint of one block set (x + out + pe).
    def _footprint(x_blk_bytes: int, pe_blk_bytes: int) -> int:
        return 2 * (2 * x_blk_bytes + pe_blk_bytes)

    BUDGET = 44 << 20                        # keep headroom under v7x 64 MiB VMEM

    seq_tiled = (slab_bytes >= target) and (R >= 8)

    if seq_tiled:
        # ---- long-sequence regime: tile rows, batch is the inner grid axis ----
        tr = max(8, min((target // row_bytes) // 8 * 8, (R // 8) * 8))
        while _footprint(tr * row_bytes, tr * L * 4) > BUDGET and tr > 8:
            tr = max(8, (tr // 2) // 8 * 8)
        # >= 4 total grid steps (>= 2 per TensorCore on v7x megacore)
        while pl.cdiv(R, tr) * B < 4 and tr > 8:
            tr = max(8, (tr // 2) // 8 * 8)

        n_r = pl.cdiv(R, tr)
        grid = (n_r, B)                      # batch innermost -> PE tile reused over B
        in_specs = [
            pl.BlockSpec((None, tr, L), lambda r, b: (b, r, 0)),
            pl.BlockSpec((tr, L), lambda r, b: (r, 0)),
        ]
        out_specs = pl.BlockSpec((None, tr, L), lambda r, b: (b, r, 0))
        dim_sem = ("parallel", "parallel")
        if (R, L) == (S, D):
            pe_pass = pe_table               # index straight into the table (no slice copy)
        else:
            pe_pass = pe_table[:S].reshape(R, L)
        x_blk_bytes, pe_blk_bytes = tr * row_bytes, tr * L * 4
    else:
        # ---- short-seq / large-batch regime: fold batch into the block --------
        kb = max(1, min(B, target // max(1, slab_bytes)))
        while _footprint(kb * slab_bytes, R * L * 4) > BUDGET and kb > 1:
            kb = max(1, kb // 2)
        while pl.cdiv(B, kb) < 4 and kb > 1:
            kb = max(1, kb // 2)

        grid = (pl.cdiv(B, kb),)
        in_specs = [
            pl.BlockSpec((kb, R, L), lambda i: (i, 0, 0)),
            pl.BlockSpec((R, L), lambda i: (0, 0)),   # invariant -> resident PE block
        ]
        out_specs = pl.BlockSpec((kb, R, L), lambda i: (i, 0, 0))
        dim_sem = ("parallel",)
        pe_pass = pe_table[:S].reshape(R, L)
        x_blk_bytes, pe_blk_bytes = kb * slab_bytes, R * L * 4

    footprint = _footprint(x_blk_bytes, pe_blk_bytes)
    vmem_limit = int(min(56 << 20, max(footprint + (4 << 20), 16 << 20)))

    cost = pl.CostEstimate(
        flops=B * S * D,
        transcendentals=0,
        bytes_accessed=2 * B * S * D * isz + S * D * 4,
    )

    out = pl.pallas_call(
        _pe_add_kernel,
        out_shape=jax.ShapeDtypeStruct((B, R, L), x.dtype),
        grid_spec=pltpu.PrefetchScalarGridSpec(
            num_scalar_prefetch=0,
            grid=grid,
            in_specs=in_specs,
            out_specs=out_specs,
        ),
        compiler_params=pltpu.CompilerParams(
            dimension_semantics=dim_sem,
            vmem_limit_bytes=vmem_limit,
        ),
        cost_estimate=cost,
        input_output_aliases=({0: 0} if donate_x else {}),
    )(x_v, pe_pass)

    return out.reshape(B, S, D)


if __name__ == "__main__":
    max_len = 5000
    key = jax.random.PRNGKey(0)

    def _check(x, pe_table, **kw):
        out = jax.block_until_ready(positional_encoding_forward(x, pe_table, **kw))
        S = x.shape[1]
        ref = (x.astype(jnp.float32) + pe_table[None, :S, :]).astype(x.dtype)
        assert out.shape == x.shape and out.dtype == x.dtype
        assert jnp.allclose(out, ref, atol=1e-6, rtol=1e-6), "mismatch vs reference"

    # 1) Small shape consistent with the module; exercises the lane-dense refold
    #    (D=32 -> (R, L) = (2, 128)) + batch-grouped path.
    B, S, D = 2, 8, 32
    x = jax.random.normal(key, (B, S, D), dtype=jnp.float32)
    _check(x, build_pe_table(D, max_len))

    # 2) Long-sequence tiled path (forced via a small block target so the
    #    multi-row-tile / batch-inner grid is exercised at modest array sizes).
    B2, S2, D2 = 2, 512, 256
    x2 = jax.random.normal(jax.random.PRNGKey(1), (B2, S2, D2), dtype=jnp.float32)
    _check(x2, build_pe_table(D2, max_len), block_byte_target=64 << 10)

    # 3) Short-seq / large-batch regime: batch folded into the block (kb > 1),
    #    single resident PE block broadcast over the folded batch dim.
    B3, S3, D3 = 8, 16, 64
    x3 = jax.random.normal(jax.random.PRNGKey(2), (B3, S3, D3), dtype=jnp.float32)
    _check(x3, build_pe_table(D3, max_len))

    # 4) Fully unaligned fallback (neither D nor S*D multiple of 128): correct,
    #    just takes the masked-store path noted in the TODO.
    B4, S4, D4 = 3, 8, 24
    x4 = jax.random.normal(jax.random.PRNGKey(3), (B4, S4, D4), dtype=jnp.float32)
    _check(x4, build_pe_table(D4, max_len))

    print("KERNEL_OK")
</pallas_src>

<mosaic_0001>
module attributes {stable_mosaic.version = 11 : i64} {
  func.func @_pe_add_kernel(%arg0: i32, %arg1: memref<1x2x128xf32, #tpu.memory_space<vmem>>, %arg2: memref<2x128xf32, #tpu.memory_space<vmem>>, %arg3: memref<1x2x128xf32, #tpu.memory_space<vmem>>) attributes {dimension_semantics = [#tpu.dimension_semantics<parallel>], iteration_bounds = array<i64: 2>, scalar_prefetch = 0 : i64, scratch_operands = 0 : i64, tpu.core_type = #tpu.core_type<tc>, window_params = [{transform_indices = @transform_0, window_bounds = array<i64: 1, 2, 128>}, {pipeline_mode = #tpu.pipeline_mode<synchronous>, transform_indices = @transform_1, window_bounds = array<i64: 2, 128>}, {transform_indices = @transform_2, window_bounds = array<i64: 1, 2, 128>}]} {
    %c0 = arith.constant 0 : index
    %c0_0 = arith.constant 0 : index
    %c0_1 = arith.constant 0 : index
    %0 = vector.load %arg1[%c0, %c0_0, %c0_1] : memref<1x2x128xf32, #tpu.memory_space<vmem>>, vector<1x2x128xf32>
    %c0_2 = arith.constant 0 : index
    %c0_3 = arith.constant 0 : index
    %1 = vector.load %arg2[%c0_2, %c0_3] : memref<2x128xf32, #tpu.memory_space<vmem>>, vector<2x128xf32>
    %2 = vector.shape_cast %1 : vector<2x128xf32> to vector<1x2x128xf32>
    %3 = arith.addf %0, %2 : vector<1x2x128xf32>
    %c0_4 = arith.constant 0 : index
    %c0_5 = arith.constant 0 : index
    %c0_6 = arith.constant 0 : index
    %4 = vector.load %arg3[%c0_4, %c0_5, %c0_6] : memref<1x2x128xf32, #tpu.memory_space<vmem>>, vector<1x2x128xf32>
    tpu.vector_store %arg3[%c0_4, %c0_5, %c0_6], %3 {strides = array<i32>} : memref<1x2x128xf32, #tpu.memory_space<vmem>>, vector<1x2x128xf32>,
    return
  }
  func.func @transform_0(%arg0: i32) -> (i32, i32, i32) {
    %c0_i32 = arith.constant 0 : i32
    %c0_i32_0 = arith.constant 0 : i32
    %c0_i32_1 = arith.constant 0 : i32
    return %arg0, %c0_i32, %c0_i32_0 : i32, i32, i32
  }
  func.func @transform_1(%arg0: i32) -> (i32, i32) {
    %c0_i32 = arith.constant 0 : i32
    %c0_i32_0 = arith.constant 0 : i32
    %c0_i32_1 = arith.constant 0 : i32
    return %c0_i32, %c0_i32_0 : i32, i32
  }
  func.func @transform_2(%arg0: i32) -> (i32, i32, i32) {
    %c0_i32 = arith.constant 0 : i32
    %c0_i32_0 = arith.constant 0 : i32
    %c0_i32_1 = arith.constant 0 : i32
    return %arg0, %c0_i32, %c0_i32_0 : i32, i32, i32
  }
}

</mosaic_0001>

<bundles_post_ra>
// kernel: tpu_custom_call.1
= control target key start
LH: loop header
LB: loop body
LE: loop exit
PB: predicated region body
PF: predicated region fallthrough
CT: control target
= control target key end

     0   :  { %7 = vsyncpa [#allocation3], 0  ;;  %s633_s0 = inlined_call_operand.hbm [shape: f32[2,2,128], index: 0, kind: input, shape index: {}]   ;;  %s634_s1 = inlined_call_operand.hbm [shape: f32[2,128], index: 1, kind: input, shape index: {}]   ;;  %s635_s2 = inlined_call_operand.hbm [shape: f32[2,2,128], index: 2, kind: output, shape index: {}]  }
   0x1   :  { %9 = vsyncpa [#allocation3 + $0x1], 0 }
   0x2   :  { %10 = vsyncpa [#allocation6], 0 }
   0x3   :  { %11 = vsyncpa [#allocation4], 0 }
   0x4   :  { %13 = vsyncpa [#allocation4 + $0x1], 0  ;;  %s495_s9 = smov 0   ;;  %s497_s10 = smov 0  }
   0x5   :  { %s499_s11 = smov 0   ;;  %s501_s12 = smov 0  }
   0x6 LB: > { %s516_s13 = sadd.s32 4294967295, %s477_s12   ;;  %s276_s14 = sadd.s32 4294967294, %s477_s12   ;;  %s477_s12 = sphi %s501_s12, %s645_s12   ;;  %s473_s11 = sphi %s499_s11, %s644_s11   ;;  %s469_s10 = sphi %s497_s10, %s643_s10   ;;  %s465_s9 = sphi %s495_s9, %s642_s9  }
   0x7   : > { %p39_p0 = scmp.ne.s32.totalorder %s469_s10, %s465_s9  ;;  %p40_p1 = scmp.eq.s32.totalorder %s516_s13, 0 }
   0x8   : > { %p84_p2 = scmp.eq.s32.totalorder %s516_s13, 1  ;;  %p90_p3 = scmp.eq.s32.totalorder %s276_s14, 1 }
   0x9   : > { %p525_p4 = por %p40_p1, %p39_p0  ;;  %p277_p5 = scmp.ge.s32.totalorder %s477_s12, 1 }
   0xa   : > { %p530_p6 = por %p90_p3, %p39_p0  ;;  %p97_p7 = scmp.lt.s32.totalorder %s477_s12, 3 }
   0xb   : > { %s109_s19 = sshll.u32 %s634_s1, 4  ;;  %s479_s21 = smov [#allocation5]   ;;  %s110_s19 = int_to_ptr.hbm [resolvable:$true] %s109_s19 }
   0xc   : > { %p538_p8 = pnand %p277_p5, %p97_p7  ;;  %s111_s22 = sshll.u32 %s479_s21, 4  ;;  %s112_s22 = int_to_ptr.vmem [resolvable:$true] %s111_s22 }
   0xd   : > { %s548_s23 = sadd.s32 1, %s477_s12   ;;  %s26_s24 = sadd.s32 1, %s473_s11 }
   0xe   : > { %p298_p10 = pneg %p538_p8  ;;  %s23_s25 = ssub.s32 %s477_s12, %s548_s23 }
   0xf   : > { %p24_p12 = scmp.eq.s32.totalorder %s23_s25, 0  ;;  %p33_p13 = scmp.ne.s32.totalorder %s473_s11, %s469_s10 }
  0x10   : > { %p299_p11 = pnand %p298_p10, %p40_p1  ;;  %p34_p0 = scmp.eq.s32.totalorder %s477_s12, 0 }
  0x11   : > { %s557_s26 = scalar_select %p24_p12, %s473_s11, %s26_s24  }
  0x12   : > { %301 = dma.hbm_to_vmem [thread:$0]  (!%p299_p11), %s110_s19, 32, %s112_s22, [#allocation6]  }
  0x13   : > { %p561_p3 = por %p84_p2, %p33_p13  ;;  %p311_p5 = scmp.lt.s32.totalorder %s477_s12, 2 }
  0x14   : > { %s122_s28 = sand.u32 1, %s473_s11   ;;  %s281_s29 = sshll.u32 %s477_s12, 1 }
  0x15   : > { %p35_p7 = por %p34_p0, %p33_p13  ;;  %s280_s30 = sshll.u32 %s122_s28, 1 }
  0x16   : > { %s130_s5 = scalar_lea.hbm %s633_s0, %s281_s29  ;;  %s126_s7 = scalar_lea.vmem [#allocation2], %s280_s30 }
  0x17   : > { %s132_s6 = sshll.u32 %s130_s5, 4  ;;  %s134_s8 = sshll.u32 %s126_s7, 4  ;;  %s133_s6 = int_to_ptr.hbm [resolvable:$true] %s132_s6  ;;  %s135_s8 = int_to_ptr.vmem [resolvable:$true] %s134_s8 }
  0x18   : > { %p571_p10 = pnand %p311_p5, %p35_p7  ;;  %s123_s17 = scalar_lea.sflag [#allocation3], %s122_s28 }
  0x19   : > { %s377_s18 = sshra.s32 %s133_s6, 4  ;;  %s384_s24 = scalar_lea.hbm %s633_s0, 4  ;;  %s378_s18 = int_to_ptr.hbm [resolvable:$true] %s377_s18 }
  0x1a   : > { %s379_s19 = scalar_lea.hbm %s378_s18, 2  ;;  %p381_p11 = pneg %p571_p10 }
  0x1b   : > { %p380_p2 = scmp.ne.s32.totalorder %s378_s18, %s379_s19  ;;  %p385_p0 = scmp.lt.s32.totalorder %s378_s18, %s633_s0 }
  0x1c   : > { %p386_p5 = scmp.lt.s32.totalorder %s384_s24, %s379_s19 }
  0x1d   : > { %p382_p12 = pnand %p381_p11, %p380_p2 }
  0x1e   : > { %p387_p7 = por %p386_p5, %p385_p0 }
  0x1f   : > { %p383_p13 = pneg %p382_p12 }
  0x21   : > { %p388_p9 = pnand %p387_p7, %p383_p13 }
  0x23   : > { %391 = shalt.err (!%p388_p9)
}
  0x24   : > { %305 = dma.hbm_to_vmem [thread:$0]  (!%p571_p10), %s133_s6, 32, %s135_s8, %s123_s17  }
  0x25   : > { %143 = sbr.rel (%p538_p8) target bundleno = 60 (0x3c), region = 28  ;;  %s588_s28 = sand.u32 (!%p538_p8), 1, %s469_s10  }
  0x26   : > { %s283_s30 = sshll.u32 (!%p538_p8), %s588_s28, 1  ;;  %s146_s3 = scalar_lea.sflag (!%p538_p8), [#allocation3], %s588_s28 }
  0x27   : > { %s149_s4 = scalar_lea.vmem (!%p538_p8), [#allocation2], %s283_s30 }
  0x2a   : > { %452 = dma.done.wait (%p525_p4), %s146_s3, 32  }
  0x2b   : > { %454 = vsyncadd (%p525_p4), %s146_s3, 4294967264 }
  0x2c   : > { %456 = dma.done.wait (%p40_p1), [#allocation6], 32  }
  0x2d   : > { %458 = vsyncadd (%p40_p1), [#allocation6], 4294967264  ;;  %s287_s20 = sshll.u32 %s516_s13, 1  ;;  %s175_s8 = scalar_lea.vmem [#allocation7], %s283_s30  ;;  %v176_v0 = vld [vmem:[%s149_s4] sm:$0x3] }
  0x2e   : > { %s191_s7 = scalar_lea.hbm %s635_s2, %s287_s20  ;;  %s193_s14 = sshll.u32 %s175_s8, 4  ;;  %v177_v1 = vld [vmem:[#allocation5] sm:$0x3]  ;;  %s194_s14 = int_to_ptr.vmem [resolvable:$true] %s193_s14 }
  0x2f   : > { %s195_s17 = sshll.u32 %s191_s7, 4  ;;  %v178_v2 = vadd.f32 %v177_v1, %v176_v0  ;;  %s181_s15 = scalar_lea.sflag [#allocation4], %s588_s28  ;;  %s196_s17 = int_to_ptr.hbm [resolvable:$true] %s195_s17 }
  0x30   : > { %s421_s18 = sshra.s32 %s196_s17, 4  ;;  %s427_s22 = scalar_lea.hbm %s635_s2, 4  ;;  %s422_s18 = int_to_ptr.hbm [resolvable:$true] %s421_s18 }
  0x31   : > { %179 = vst [vmem:[%s175_s8] sm:$0x3] %v178_v2  ;;  %s423_s19 = scalar_lea.hbm %s422_s18, 2  ;;  %p428_p9 = scmp.lt.s32.totalorder %s422_s18, %s635_s2 }
  0x32   : > { %p424_p1 = scmp.ne.s32.totalorder %s422_s18, %s423_s19  ;;  %p429_p10 = scmp.lt.s32.totalorder %s427_s22, %s423_s19 }
  0x34   : > { %p425_p4 = pnand %p424_p1, %p561_p3  ;;  %p430_p2 = por %p429_p10, %p428_p9 }
  0x36   : > { %p426_p8 = pneg %p425_p4 }
  0x38   : > { %p431_p11 = pnand %p430_p2, %p426_p8 }
  0x3a   : > { %434 = shalt.err (!%p431_p11)
}
  0x3b   : > { %296 = dma.vmem_to_hbm [thread:$0]  (%p561_p3), %s194_s14, 32, %s196_s17, %s181_s15  }
  0x3c PF: > { %s207_s29 = sand.u32 1, %s465_s9   ;;  %p641_p12 = scmp.ge.s32.totalorder %s477_s12, 2 }
  0x3d   : > { %s208_s28 = scalar_lea.sflag [#allocation4], %s207_s29 }
  0x3e   : > { %p307_p13 = pnand %p641_p12, %p530_p6 }
  0x40   : > { %p308_p0 = pneg %p307_p13 }
  0x42   : > { %460 = dma.done.wait (%p308_p0), %s208_s28, 32  }
  0x43   : > { %462 = vsyncadd (%p308_p0), %s208_s28, 4294967264  ;;  %p16_p5 = scmp.ge.s32.totalorder %s548_s23, 4   ;;  %s642_s9 = smov %s469_s10 }
  0x44   : > { %s643_s10 = smov %s473_s11  ;;  %s644_s11 = smov %s557_s26 }
  0x45   : > { %s645_s12 = smov %s548_s23  ;;  %18 = sbr.rel (!%p16_p5) target bundleno = 6 (0x6), region = 77 }
  0x4a   :  { %214 = vsyncpa [#allocation3], 1 }
  0x4b   :  { %216 = vsyncpa [#allocation3 + $0x1], 1 }
  0x4c   :  { %217 = vsyncpa [#allocation6], 1 }
  0x4d   :  { %218 = vsyncpa [#allocation4], 1 }
  0x4e   :  { %220 = vsyncpa [#allocation4 + $0x1], 1 }

</bundles_post_ra>
